<compile_context>
chip_gen: v5e
topology: v5e:2x2
jax: 0.10.0
libtpu: 0.0.40
codegen_flags: <defaults>
</compile_context>

<pallas_src>
import functools
import math

import jax
import jax.numpy as jnp
from jax.experimental import pallas as pl
from jax.experimental.pallas import tpu as pltpu


# ---------------------------------------------------------------------------
# Parameter setup (same math as the PyTorch __init__) — plain JAX, done once.
# ---------------------------------------------------------------------------
def make_pe(d_model: int, max_len: int = 10000) -> jnp.ndarray:
    """Replicates the PyTorch buffer: shape (max_len, 1, d_model), float32."""
    assert d_model % 2 == 0, "PositionalEncoding requires an even d_model"
    position = jnp.arange(0, max_len, dtype=jnp.float32)[:, None]            # (L, 1)
    div_term = jnp.exp(
        jnp.arange(0, d_model, 2, dtype=jnp.float32) * (-math.log(10000.0) / d_model)
    )                                                                         # (D/2,)
    angles = position * div_term                                              # (L, D/2)
    pe = jnp.zeros((max_len, d_model), dtype=jnp.float32)
    pe = pe.at[:, 0::2].set(jnp.sin(angles))
    pe = pe.at[:, 1::2].set(jnp.cos(angles))
    return pe[:, None, :]                                                     # (L, 1, D)


# ---------------------------------------------------------------------------
# Tiling policy.
# ---------------------------------------------------------------------------
_MIN_SPLIT_BYTES = 4 * 1024 * 1024   # only force-split sequences carrying >= this


def _generation_params():
    """(target x-tile bytes, scoped-VMEM limit bytes) per TPU generation."""
    try:
        vmem = pltpu.get_tpu_info().vmem_capacity_bytes
    except Exception:
        vmem = 64 * 1024 * 1024
    if vmem <= 64 * 1024 * 1024:
        # v7x: fast HBM makes per-step overhead relatively large -> bigger tiles,
        # but physical VMEM is 64 MiB, so raise the scoped limit only to 44 MiB.
        return 6 * 1024 * 1024, 44 * 1024 * 1024
    # v5e / v6e (128 MiB physical): 4 MiB tiles.  32 MiB limit == v6e default and
    # explicitly raises v5e's 16 MiB scoped default so double-buffering fits.
    return 4 * 1024 * 1024, 32 * 1024 * 1024


def _align_up(n: int, m: int) -> int:
    return -(-n // m) * m


def _sublane_pack(itemsize: int) -> int:
    # rows per packed sublane group: f32 -> 8, bf16/f16 -> 16, int8/fp8 -> 32
    return max(8, 32 // max(itemsize, 1))


def _choose_ts(seq_len: int, row_bytes: int, pack: int, target_bytes: int) -> int:
    """Sequence-tile size: biggest pack-aligned tile inside the byte budget, but
    capped so large inputs get >= 8 grid steps (>= 4 per v7x TensorCore)."""
    ts = max(1, target_bytes // max(row_bytes, 1))
    if seq_len * row_bytes >= _MIN_SPLIT_BYTES and seq_len >= 8 * pack:
        ts = min(ts, _align_up(-(-seq_len // 8), pack))
    if ts >= seq_len:
        return seq_len                          # full-extent block: always legal
    return max(pack, (ts // pack) * pack)       # pack-aligned partial blocks


def _choose_lane_tile(total_lanes: int, d: int, batch: int,
                      itemsize: int, pack: int, target_bytes: int):
    """Lane-dim tile for very wide rows.  Returns (lane_block, batch_per_block).
    lane_block == total_lanes means no lane-axis grid (common case)."""
    if total_lanes * itemsize * pack <= target_bytes:
        return total_lanes, batch
    if batch == 1:
        w = (target_bytes // (pack * itemsize)) // 128 * 128
        w = min(max(w, 128), total_lanes)
        return w, 1
    # Tile over whole batches; block lane width bc*D must be a 128-multiple.
    step = 128 // math.gcd(d, 128)
    bc = (target_bytes // (pack * d * itemsize)) // step * step
    bc = min(max(bc, step), batch)
    if bc >= batch:
        return total_lanes, batch
    return bc * d, bc


# ---------------------------------------------------------------------------
# Kernels.
# ---------------------------------------------------------------------------
def _add_pe_3d_kernel(x_ref, pe_ref, o_ref):
    # x: (TS, BS, D), pe: (TS, 1, D) -> free sublane broadcast across batch.
    o_ref[...] = (x_ref[...] + pe_ref[...]).astype(o_ref.dtype)


def _add_pe_flat_kernel(x_ref, pe_ref, o_ref, *, batch: int, d: int, d_aligned: bool):
    # x/o: (TS, batch*d) lane-dense.  pe: (TS, d) (or the matching (TS, W) window
    # when batch == 1).  pe HBM traffic stays S*D; replication happens in VMEM.
    pe = pe_ref[...]
    if batch == 1:
        o_ref[...] = (x_ref[...] + pe).astype(o_ref.dtype)
    elif d_aligned:
        # D % 128 == 0: 128-aligned per-batch lane slices — no replicated pe temp.
        for b in range(batch):
            sl = slice(b * d, (b + 1) * d)
            o_ref[:, sl] = (x_ref[:, sl] + pe).astype(o_ref.dtype)
    else:
        # jnp.tile (single op) instead of a concatenate chain.
        o_ref[...] = (x_ref[...] + jnp.tile(pe, (1, batch))).astype(o_ref.dtype)


# ---------------------------------------------------------------------------
# Wrapper.
# ---------------------------------------------------------------------------
def positional_encoding(x: jnp.ndarray, pe: jnp.ndarray, *,
                        donate_x: bool = False) -> jnp.ndarray:
    """x: (S, B, D); pe: (max_len, 1, D) float32.  Returns x + pe[:S] (bcast over B)."""
    S, B, D = x.shape
    max_len = pe.shape[0]
    assert pe.shape == (max_len, 1, D), "pe buffer shape mismatch"
    assert S <= max_len, "sequence longer than max_len"

    itemsize = jnp.dtype(x.dtype).itemsize
    pack = _sublane_pack(itemsize)
    target_bytes, vmem_limit = _generation_params()

    cost = pl.CostEstimate(
        flops=S * B * D,
        transcendentals=0,
        bytes_accessed=2 * S * B * D * itemsize + S * D * 4,   # pe is always f32
    )
    io_alias = {0: 0} if donate_x else {}

    # Padding-free 3-D path only when the (B, D) minor dims tile perfectly.
    use_3d = (B % pack == 0) and (D % 128 == 0)

    if use_3d:
        min_rows = 8                          # ts is an outer dim: no pack constraint
        bs = B
        if B * D * itemsize * min_rows > target_bytes:    # wide rows: tile batch too
            bs = (target_bytes // (min_rows * D * itemsize)) // pack * pack
            bs = min(max(bs, pack), B)
        ts = _choose_ts(S, bs * D * itemsize, min_rows, target_bytes)
        return pl.pallas_call(
            _add_pe_3d_kernel,
            out_shape=jax.ShapeDtypeStruct((S, B, D), x.dtype),
            grid_spec=pltpu.PrefetchScalarGridSpec(
                num_scalar_prefetch=0,
                grid=(pl.cdiv(S, ts), pl.cdiv(B, bs)),
                in_specs=[
                    pl.BlockSpec((ts, bs, D), lambda s, b: (s, b, 0)),   # x tile
                    pl.BlockSpec((ts, 1, D), lambda s, b: (s, 0, 0)),    # pe window
                ],
                out_specs=pl.BlockSpec((ts, bs, D), lambda s, b: (s, b, 0)),
            ),
            compiler_params=pltpu.CompilerParams(
                dimension_semantics=("parallel", "parallel"),
                vmem_limit_bytes=vmem_limit,
            ),
            cost_estimate=cost,
            input_output_aliases=io_alias,
        )(x, pe)

    # ---- Flat lane-dense path (default for small / misaligned batch) ----
    L = B * D
    lane_block, bc = _choose_lane_tile(L, D, B, itemsize, pack, target_bytes)
    row_bytes = _align_up(lane_block, 128) * itemsize        # padded VMEM footprint
    ts = _choose_ts(S, row_bytes, pack, target_bytes)

    x2 = x.reshape(S, L)                     # contiguous merge: no data movement
    pe2 = pe.reshape(max_len, D)
    # pe's block first dim must be 8-aligned or equal its full extent; ts is always
    # pack-aligned unless it equals S, so only that rare corner needs a slice.
    pe_src = pe2 if ts % 8 == 0 else pe2[:S]

    if B == 1:
        pe_block = (ts, lane_block)
        pe_map = lambda s, w: (s, w)
    else:
        pe_block = (ts, D)
        pe_map = lambda s, w: (s, 0)

    kernel = functools.partial(
        _add_pe_flat_kernel, batch=bc, d=D, d_aligned=(D % 128 == 0))

    out = pl.pallas_call(
        kernel,
        out_shape=jax.ShapeDtypeStruct((S, L), x.dtype),
        grid_spec=pltpu.PrefetchScalarGridSpec(
            num_scalar_prefetch=0,
            grid=(pl.cdiv(S, ts), pl.cdiv(L, lane_block)),
            in_specs=[
                pl.BlockSpec((ts, lane_block), lambda s, w: (s, w)),   # x tile
                pl.BlockSpec(pe_block, pe_map),                        # pe window
            ],
            out_specs=pl.BlockSpec((ts, lane_block), lambda s, w: (s, w)),
        ),
        compiler_params=pltpu.CompilerParams(
            dimension_semantics=("parallel", "parallel"),
            vmem_limit_bytes=vmem_limit,
        ),
        cost_estimate=cost,
        input_output_aliases=io_alias,
    )(x2, pe_src)
    return out.reshape(S, B, D)


if __name__ == "__main__":
    key = jax.random.PRNGKey(0)
    pe_cache = {}

    def get_pe(d):
        if d not in pe_cache:
            pe_cache[d] = make_pe(d, max_len=10000)
        return pe_cache[d]

    # (S, B, D) — small shapes exercising every code path:
    tests = [
        (8, 2, 32),      # tiny; flat path, pe replicated with jnp.tile
        (5, 2, 32),      # S not a multiple of 8 -> full-extent blocks (pe sliced)
        (8, 1, 32),      # batch == 1 -> squeezed (S, D) path
        (16, 4, 32),     # D < 128 but B*D lane-dense -> flat path
        (256, 4, 128),   # D % 128 == 0, B < 8 -> flat path w/ per-batch slices
        (2048, 2, 256),  # big enough to force >= 8 pipelined sequence blocks
        (1024, 8, 128),  # B % 8 == 0 and D % 128 == 0 -> 3-D sublane-broadcast path
    ]
    for i, (S, B, D) in enumerate(tests):
        k = jax.random.fold_in(key, i)
        x = jax.random.normal(k, (S, B, D), dtype=jnp.float32)
        pebuf = get_pe(D)
        out = jax.block_until_ready(positional_encoding(x, pebuf))
        ref = x + pebuf[:S]                    # pure-JAX reference (PyTorch semantics)
        assert out.shape == (S, B, D)
        assert jnp.allclose(out, ref, atol=1e-6), f"mismatch vs reference in test {i}"

    print("KERNEL_OK")
</pallas_src>

<mosaic_0001>
module attributes {stable_mosaic.version = 11 : i64} {
  func.func @_add_pe_flat_kernel(%arg0: i32, %arg1: i32, %arg2: memref<8x64xf32, #tpu.memory_space<vmem>>, %arg3: memref<8x32xf32, #tpu.memory_space<vmem>>, %arg4: memref<8x64xf32, #tpu.memory_space<vmem>>) attributes {dimension_semantics = [#tpu.dimension_semantics<parallel>, #tpu.dimension_semantics<parallel>], iteration_bounds = array<i64: 1, 1>, scalar_prefetch = 0 : i64, scratch_operands = 0 : i64, tpu.core_type = #tpu.core_type<tc>, window_params = [{transform_indices = @transform_0, window_bounds = array<i64: 8, 64>}, {transform_indices = @transform_1, window_bounds = array<i64: 8, 32>}, {transform_indices = @transform_2, window_bounds = array<i64: 8, 64>}]} {
    %c0 = arith.constant 0 : index
    %c0_0 = arith.constant 0 : index
    %0 = vector.load %arg3[%c0, %c0_0] : memref<8x32xf32, #tpu.memory_space<vmem>>, vector<8x32xf32>
    %c0_1 = arith.constant 0 : index
    %c0_2 = arith.constant 0 : index
    %1 = vector.load %arg2[%c0_1, %c0_2] : memref<8x64xf32, #tpu.memory_space<vmem>>, vector<8x64xf32>
    %2 = tpu.concatenate %0, %0 in 1 : vector<8x32xf32>, vector<8x32xf32> -> vector<8x64xf32>
    %3 = arith.addf %1, %2 : vector<8x64xf32>
    %c0_3 = arith.constant 0 : index
    %c0_4 = arith.constant 0 : index
    %4 = vector.load %arg4[%c0_3, %c0_4] : memref<8x64xf32, #tpu.memory_space<vmem>>, vector<8x64xf32>
    tpu.vector_store %arg4[%c0_3, %c0_4], %3 {strides = array<i32>} : memref<8x64xf32, #tpu.memory_space<vmem>>, vector<8x64xf32>,
    return
  }
  func.func @transform_0(%arg0: i32, %arg1: i32) -> (i32, i32) {
    %c0_i32 = arith.constant 0 : i32
    return %arg0, %arg1 : i32, i32
  }
  func.func @transform_1(%arg0: i32, %arg1: i32) -> (i32, i32) {
    %c0_i32 = arith.constant 0 : i32
    %c0_i32_0 = arith.constant 0 : i32
    return %arg0, %c0_i32 : i32, i32
  }
  func.func @transform_2(%arg0: i32, %arg1: i32) -> (i32, i32) {
    %c0_i32 = arith.constant 0 : i32
    return %arg0, %arg1 : i32, i32
  }
}

</mosaic_0001>

<bundles_post_ra>
// kernel: tpu_custom_call.1
= control target key start
LH: loop header
LB: loop body
LE: loop exit
PB: predicated region body
PF: predicated region fallthrough
CT: control target
= control target key end

     0   :  { %s93_s0 = inlined_call_operand.vmem [shape: f32[8,64], index: 0, kind: input, shape index: {}]   ;;  %s94_s1 = inlined_call_operand.vmem [shape: f32[10000,32], index: 1, kind: input, shape index: {}]   ;;  %s95_s2 = inlined_call_operand.hbm [shape: f32[8,64], index: 2, kind: output, shape index: {}]  }
   0x1   :  { %v12_v0 = vld [vmem:[%s94_s1] sm:$0xff] }
   0x2   :  { %7 = vsyncpa [#allocation3], 0  ;;  %s67_s11 = smov 32   ;;  %vm18_vm0 = vcmask 261120   ;;  %v13_v1 = vld [vmem:[%s93_s0] sm:$0xff]  ;;  %s68_s14 = smov [#allocation2]  }
   0x3   :  { %15 = vrot.lane.b32.xlu0 %v12_v0, %s67_s11  ;;  %s28_s15 = sshll.u32 %s68_s14, 4  ;;  %s30_s18 = sshll.u32 %s95_s2, 4  ;;  %vm21_vm1 = vcmask 523264   ;;  %s29_s15 = int_to_ptr.vmem [resolvable:$true] %s28_s15  ;;  %s31_s18 = int_to_ptr.hbm [resolvable:$true] %s30_s18 }
  0x75   :  { %v16_v2 = vpop.permute.xlu0 %15 }
  0x76   :  { %v19_v3 = vsel %vm18_vm0, %v12_v0, %v16_v2 }
  0x77   :  { %v20_v4 = vadd.f32 %v19_v3, %v13_v1 }
  0x79   :  { %22 = vst.msk [vmem:[#allocation2] sm:$0xff] %vm21_vm1, %v20_v4 }
  0x7a   :  { %33 = dma.vmem_to_hbm [thread:$0]  %s29_s15, 128, %s31_s18, [#allocation3]  }
  0x7b   :  { %65 = dma.done.wait [#allocation3], 128  }
  0x7c   :  { %66 = vsyncadd [#allocation3], 4294967168 }
  0x7d   :  { %38 = vsyncpa [#allocation3], 1 }

</bundles_post_ra>
